<compile_context>
chip_gen: v7x
topology: tpu7x:2x2x1
jax: 0.10.0
libtpu: 0.0.40
codegen_flags: <defaults>
</compile_context>

<pallas_src>
import functools

import jax
import jax.numpy as jnp
from jax.experimental import pallas as pl
from jax.experimental.pallas import tpu as pltpu

# ----------------------------- configuration ------------------------------
K = 2
INPUT_DIM = 32
HIDDEN_DIMS = [64, 32]          # len == K
NUM_GRAPH_NODES = 64
NUM_TARGET = 8

SUBLANE = 8                     # row-count padding target (f32 sublane width)


def _round_up(x, m):
    return ((x + m - 1) // m) * m


# ------------------------------ Pallas kernel -----------------------------
def sage_fused_kernel(h0_ref, sa1_ref, sa2_ref, w1_ref, b1_ref, w2_ref, b2_ref,
                      o_ref):
    """Fused 2-layer GraphSAGE forward (mean agg + concat-linear + ReLU).

    h0_ref : (N0p, d0)   bf16  zero-padded-rows input features of batch_nodes[0]
    sa1_ref: (2*N1p, N0p) bf16 stacked [S1 ; A1]
    sa2_ref: (2*N2p, N1p) bf16 stacked [S2 ; A2]
    w1_ref : (2*d0, d1)  bf16  [W_self1 ; W_neigh1]   (row-stacked, no zero rows)
    b1_ref : (1, d1)     f32
    w2_ref : (2*d1, d2)  bf16  [W_self2 ; W_neigh2]
    b2_ref : (1, d2)     f32
    o_ref  : (N2p, d2)   f32   (rows beyond the real node count are garbage and
                                are sliced off by the wrapper)
    """
    h0 = h0_ref[...]                                                  # (N0p, d0)

    # ---------------- layer 1 ----------------
    # One stacked aggregation matmul; result rows [0:N1p] = S@h, [N1p:] = A@h.
    m1 = jnp.dot(sa1_ref[...], h0, preferred_element_type=jnp.float32)
    n1 = m1.shape[0] // 2
    w1 = w1_ref[...]
    d0 = w1.shape[0] // 2
    # Two natural-K encoder dots on sublane-aligned slices (== cat+Linear, but
    # without materializing a lane-concat buffer or padding K with zeros).
    h1 = jnp.maximum(
        jnp.dot(m1[:n1].astype(jnp.bfloat16), w1[:d0],
                preferred_element_type=jnp.float32)
        + jnp.dot(m1[n1:].astype(jnp.bfloat16), w1[d0:],
                  preferred_element_type=jnp.float32)
        + b1_ref[...],
        0.0)                                                          # (N1p, d1)

    # ---------------- layer 2 ----------------
    # Padded rows of h1 equal relu(b1); sa2's zero columns null them out.
    m2 = jnp.dot(sa2_ref[...], h1.astype(jnp.bfloat16),
                 preferred_element_type=jnp.float32)
    n2 = m2.shape[0] // 2
    w2 = w2_ref[...]
    d1 = w2.shape[0] // 2
    o_ref[...] = jnp.maximum(
        jnp.dot(m2[:n2].astype(jnp.bfloat16), w2[:d1],
                preferred_element_type=jnp.float32)
        + jnp.dot(m2[n2:].astype(jnp.bfloat16), w2[d1:],
                  preferred_element_type=jnp.float32)
        + b2_ref[...],
        0.0)


@functools.partial(jax.jit, static_argnames=("n_out",))
def sage_forward_fused(h0, sa1, sa2, w1, b1, w2, b2, *, n_out):
    """Single jitted XLA program: one grid-less pallas_call + output row slice."""
    n2p = sa2.shape[0] // 2
    d_out = w2.shape[1]
    vmem = pl.BlockSpec(memory_space=pltpu.MemorySpace.VMEM)

    # True (unpadded-lane) flop / byte counts, bf16-aware.
    flops = 2 * (sa1.shape[0] * sa1.shape[1] * h0.shape[1]        # layer-1 agg
                 + (sa1.shape[0] // 2) * w1.shape[0] * w1.shape[1]  # layer-1 enc
                 + sa2.shape[0] * sa2.shape[1] * w1.shape[1]      # layer-2 agg
                 + n2p * w2.shape[0] * w2.shape[1])               # layer-2 enc
    nbytes = (h0.nbytes + sa1.nbytes + sa2.nbytes + w1.nbytes + b1.nbytes
              + w2.nbytes + b2.nbytes + n2p * d_out * 4)

    out = pl.pallas_call(
        sage_fused_kernel,
        out_shape=jax.ShapeDtypeStruct((n2p, d_out), jnp.float32),
        in_specs=[vmem] * 7,
        out_specs=vmem,
        cost_estimate=pl.CostEstimate(
            flops=flops, transcendentals=0, bytes_accessed=nbytes),
    )(h0, sa1, sa2, w1, b1, w2, b2)
    return out[:n_out]


# --------------------------- graph / batch set-up --------------------------
def neighbors_of(u, n):
    # Deterministic synthetic graph (each node has 4 sampled neighbors).
    return [(u + 1) % n, (u + 2) % n, (u + 5) % n, (u * 7 + 3) % n]


def build_batch(targets, n_graph, k_layers):
    """Build batch_nodes / batch_adjList exactly like GraphSAGE minibatching."""
    batch_nodes = [None] * (k_layers + 1)
    batch_adjList = [None] * k_layers
    batch_nodes[k_layers] = list(targets)
    for k in range(k_layers, 0, -1):
        adj_k = {u: neighbors_of(u, n_graph) for u in batch_nodes[k]}
        batch_adjList[k - 1] = adj_k
        prev = set(batch_nodes[k])
        for u in batch_nodes[k]:
            prev.update(adj_k[u])
        batch_nodes[k - 1] = sorted(prev)
    return batch_nodes, batch_adjList


def build_layer_matrices(cur_nodes, prev_nodes, adj_k):
    """Selection matrix S (picks h[u]) and row-normalized adjacency A (mean agg)."""
    idx = {u: i for i, u in enumerate(prev_nodes)}
    n_cur, n_prev = len(cur_nodes), len(prev_nodes)
    S = [[0.0] * n_prev for _ in range(n_cur)]
    A = [[0.0] * n_prev for _ in range(n_cur)]
    for r, u in enumerate(cur_nodes):
        S[r][idx[u]] = 1.0
        neighs = adj_k[u]
        w = 1.0 / max(len(neighs), 1)
        for v in neighs:
            A[r][idx[v]] += w
    return jnp.array(S, jnp.float32), jnp.array(A, jnp.float32)


# ------------------------------- parameters --------------------------------
def init_params(key):
    dims = [INPUT_DIM] + HIDDEN_DIMS
    params = []
    for d_in, d_out in zip(dims[:-1], dims[1:]):
        key, kw, kb = jax.random.split(key, 3)
        bound = 1.0 / jnp.sqrt(2.0 * d_in)
        # PyTorch Linear(2*d_in, d_out): weight (d_out, 2*d_in), bias (d_out,)
        w = jax.random.uniform(kw, (d_out, 2 * d_in), jnp.float32, -bound, bound)
        b = jax.random.uniform(kb, (d_out,), jnp.float32, -bound, bound)
        w_self = w[:, :d_in].T          # (d_in, d_out)  -- concat order [nodes, neighs]
        w_neigh = w[:, d_in:].T         # (d_in, d_out)
        params.append((w_self, w_neigh, b))
    return params


# ----------------------- packed (bf16, lane-unpadded) kernel inputs --------
def pack_inputs(features, params, batch_nodes, batch_adjList):
    """Host-side (done once): build sublane-aligned, lane-UNpadded bf16 operands."""
    n = [len(nodes) for nodes in batch_nodes]
    n_pad = [_round_up(v, SUBLANE) for v in n]

    # H0: gather + zero-pad rows only (last dim = full array dim, no 128 padding).
    h0 = features[jnp.array(batch_nodes[0])]
    h0 = jnp.pad(h0, ((0, n_pad[0] - n[0]), (0, 0))).astype(jnp.bfloat16)

    # Stacked [S ; A] per layer, zero-padded rows AND columns (column zeros are
    # the invariant that nulls the relu(bias) garbage rows of the previous layer).
    sa_list = []
    prev_nodes = batch_nodes[0]
    for k in range(1, K + 1):
        cur_nodes = batch_nodes[k]
        S, A = build_layer_matrices(cur_nodes, prev_nodes, batch_adjList[k - 1])
        pad = ((0, n_pad[k] - n[k]), (0, n_pad[k - 1] - n[k - 1]))
        sa = jnp.concatenate([jnp.pad(S, pad), jnp.pad(A, pad)], axis=0)
        sa_list.append(sa.astype(jnp.bfloat16))   # entries {0,1,k/4}: exact in bf16
        prev_nodes = cur_nodes

    # Row-stacked encoder weights [W_self ; W_neigh]: (2*d_in, d_out), no zero rows.
    w_list, b_list = [], []
    for (w_self, w_neigh, b) in params:
        w_list.append(jnp.concatenate([w_self, w_neigh], axis=0).astype(jnp.bfloat16))
        b_list.append(b.reshape(1, -1))           # f32 bias, (1, d_out)

    return h0, sa_list[0], sa_list[1], w_list[0], b_list[0], w_list[1], b_list[1]


# --------------------------------- reference --------------------------------
def graphsage_forward_ref(features, params, batch_nodes, batch_adjList):
    """Pure-JAX f32 reference (same math as the module, no padding / no Pallas)."""
    prev_nodes = batch_nodes[0]
    h = features[jnp.array(prev_nodes)]
    for k in range(1, K + 1):
        cur_nodes = batch_nodes[k]
        S, A = build_layer_matrices(cur_nodes, prev_nodes, batch_adjList[k - 1])
        w_self, w_neigh, b = params[k - 1]
        h = jnp.maximum((S @ h) @ w_self + (A @ h) @ w_neigh + b.reshape(1, -1), 0.0)
        prev_nodes = cur_nodes
    return h


# ----------------------------------- main -----------------------------------
if __name__ == "__main__":
    key = jax.random.PRNGKey(0)
    k_feat, k_params = jax.random.split(key)

    # features_map (nn.Embedding equivalent): (NUM_GRAPH_NODES, INPUT_DIM)
    features = jax.random.normal(k_feat, (NUM_GRAPH_NODES, INPUT_DIM), jnp.float32)
    params = init_params(k_params)

    targets = list(range(NUM_TARGET))
    batch_nodes, batch_adjList = build_batch(targets, NUM_GRAPH_NODES, K)

    # Host-side packing done once; the device forward is one fused kernel.
    h0, sa1, sa2, w1, b1, w2, b2 = pack_inputs(
        features, params, batch_nodes, batch_adjList)

    out = sage_forward_fused(h0, sa1, sa2, w1, b1, w2, b2, n_out=NUM_TARGET)
    out = jax.block_until_ready(out)

    ref = graphsage_forward_ref(features, params, batch_nodes, batch_adjList)
    assert out.shape == (NUM_TARGET, HIDDEN_DIMS[-1]), out.shape
    # Tolerance loosened for bf16 operands (f32 accumulation kept in-kernel).
    assert jnp.allclose(out, ref, atol=3e-2, rtol=3e-2), "mismatch vs reference"

    # TODO(synk): at realistic graph sizes, replace the dense [S;A] matmul with a
    # scalar-prefetched neighbor-index gather (PrefetchScalarGridSpec + SMEM index
    # table) and mean-over-fanout on the VPU, and add a tiled grid
    # (dimension_semantics=("parallel","arbitrary"), per-generation tile sizes /
    # vmem_limit_bytes) with an f32 VMEM accumulator for the reduction axis.
    print("KERNEL_OK")
</pallas_src>

<mosaic_0001>
module attributes {stable_mosaic.version = 11 : i64} {
  func.func @sage_fused_kernel(%arg0: memref<48x32xbf16, #tpu.memory_space<vmem>>, %arg1: memref<48x48xbf16, #tpu.memory_space<vmem>>, %arg2: memref<16x24xbf16, #tpu.memory_space<vmem>>, %arg3: memref<64x64xbf16, #tpu.memory_space<vmem>>, %arg4: memref<1x64xf32, #tpu.memory_space<vmem>>, %arg5: memref<128x32xbf16, #tpu.memory_space<vmem>>, %arg6: memref<1x32xf32, #tpu.memory_space<vmem>>, %arg7: memref<8x32xf32, #tpu.memory_space<vmem>>) attributes {dimension_semantics = [], scalar_prefetch = 0 : i64, scratch_operands = 0 : i64, tpu.core_type = #tpu.core_type<tc>} {
    %c0 = arith.constant 0 : index
    %c0_0 = arith.constant 0 : index
    %0 = vector.load %arg0[%c0, %c0_0] : memref<48x32xbf16, #tpu.memory_space<vmem>>, vector<48x32xbf16>
    %c0_1 = arith.constant 0 : index
    %c0_2 = arith.constant 0 : index
    %1 = vector.load %arg1[%c0_1, %c0_2] : memref<48x48xbf16, #tpu.memory_space<vmem>>, vector<48x48xbf16>
    %cst = arith.constant dense<0.000000e+00> : vector<48x32xf32>
    %2 = tpu.matmul %1, %0, %cst {dimension_numbers = #tpu.dot_dimension_numbers<[1], [0], [0], [1], [0, 0, 1, 1], [], []>} : vector<48x48xbf16>, vector<48x32xbf16>, vector<48x32xf32> -> vector<48x32xf32>
    %c0_3 = arith.constant 0 : index
    %c0_4 = arith.constant 0 : index
    %3 = vector.load %arg3[%c0_3, %c0_4] : memref<64x64xbf16, #tpu.memory_space<vmem>>, vector<64x64xbf16>
    %4 = vector.extract_strided_slice %2 {offsets = [0, 0], sizes = [24, 32], strides = [1, 1]} : vector<48x32xf32> to vector<24x32xf32>
    %5 = arith.truncf %4 : vector<24x32xf32> to vector<24x32xbf16>
    %6 = vector.extract_strided_slice %3 {offsets = [0, 0], sizes = [32, 64], strides = [1, 1]} : vector<64x64xbf16> to vector<32x64xbf16>
    %cst_5 = arith.constant dense<0.000000e+00> : vector<24x64xf32>
    %7 = tpu.matmul %5, %6, %cst_5 {dimension_numbers = #tpu.dot_dimension_numbers<[1], [0], [0], [1], [0, 0, 1, 1], [], []>} : vector<24x32xbf16>, vector<32x64xbf16>, vector<24x64xf32> -> vector<24x64xf32>
    %8 = vector.extract_strided_slice %2 {offsets = [24, 0], sizes = [24, 32], strides = [1, 1]} : vector<48x32xf32> to vector<24x32xf32>
    %9 = arith.truncf %8 : vector<24x32xf32> to vector<24x32xbf16>
    %10 = vector.extract_strided_slice %3 {offsets = [32, 0], sizes = [32, 64], strides = [1, 1]} : vector<64x64xbf16> to vector<32x64xbf16>
    %cst_6 = arith.constant dense<0.000000e+00> : vector<24x64xf32>
    %11 = tpu.matmul %9, %10, %cst_6 {dimension_numbers = #tpu.dot_dimension_numbers<[1], [0], [0], [1], [0, 0, 1, 1], [], []>} : vector<24x32xbf16>, vector<32x64xbf16>, vector<24x64xf32> -> vector<24x64xf32>
    %12 = arith.addf %7, %11 : vector<24x64xf32>
    %c0_7 = arith.constant 0 : index
    %c0_8 = arith.constant 0 : index
    %13 = vector.load %arg4[%c0_7, %c0_8] : memref<1x64xf32, #tpu.memory_space<vmem>>, vector<1x64xf32>
    %14 = vector.broadcast %13 : vector<1x64xf32> to vector<24x64xf32>
    %15 = arith.addf %12, %14 : vector<24x64xf32>
    %cst_9 = arith.constant 0.000000e+00 : f32
    %16 = vector.broadcast %cst_9 : f32 to vector<24x64xf32>
    %17 = arith.maximumf %15, %16 : vector<24x64xf32>
    %c0_10 = arith.constant 0 : index
    %c0_11 = arith.constant 0 : index
    %18 = vector.load %arg2[%c0_10, %c0_11] : memref<16x24xbf16, #tpu.memory_space<vmem>>, vector<16x24xbf16>
    %19 = arith.truncf %17 : vector<24x64xf32> to vector<24x64xbf16>
    %cst_12 = arith.constant dense<0.000000e+00> : vector<16x64xf32>
    %20 = tpu.matmul %18, %19, %cst_12 {dimension_numbers = #tpu.dot_dimension_numbers<[1], [0], [0], [1], [0, 0, 1, 1], [], []>} : vector<16x24xbf16>, vector<24x64xbf16>, vector<16x64xf32> -> vector<16x64xf32>
    %c0_13 = arith.constant 0 : index
    %c0_14 = arith.constant 0 : index
    %21 = vector.load %arg5[%c0_13, %c0_14] : memref<128x32xbf16, #tpu.memory_space<vmem>>, vector<128x32xbf16>
    %22 = vector.extract_strided_slice %20 {offsets = [0, 0], sizes = [8, 64], strides = [1, 1]} : vector<16x64xf32> to vector<8x64xf32>
    %23 = arith.truncf %22 : vector<8x64xf32> to vector<8x64xbf16>
    %24 = vector.extract_strided_slice %21 {offsets = [0, 0], sizes = [64, 32], strides = [1, 1]} : vector<128x32xbf16> to vector<64x32xbf16>
    %cst_15 = arith.constant dense<0.000000e+00> : vector<8x32xf32>
    %25 = tpu.matmul %23, %24, %cst_15 {dimension_numbers = #tpu.dot_dimension_numbers<[1], [0], [0], [1], [0, 0, 1, 1], [], []>} : vector<8x64xbf16>, vector<64x32xbf16>, vector<8x32xf32> -> vector<8x32xf32>
    %26 = vector.extract_strided_slice %20 {offsets = [8, 0], sizes = [8, 64], strides = [1, 1]} : vector<16x64xf32> to vector<8x64xf32>
    %27 = arith.truncf %26 : vector<8x64xf32> to vector<8x64xbf16>
    %28 = vector.extract_strided_slice %21 {offsets = [64, 0], sizes = [64, 32], strides = [1, 1]} : vector<128x32xbf16> to vector<64x32xbf16>
    %cst_16 = arith.constant dense<0.000000e+00> : vector<8x32xf32>
    %29 = tpu.matmul %27, %28, %cst_16 {dimension_numbers = #tpu.dot_dimension_numbers<[1], [0], [0], [1], [0, 0, 1, 1], [], []>} : vector<8x64xbf16>, vector<64x32xbf16>, vector<8x32xf32> -> vector<8x32xf32>
    %30 = arith.addf %25, %29 : vector<8x32xf32>
    %c0_17 = arith.constant 0 : index
    %c0_18 = arith.constant 0 : index
    %31 = vector.load %arg6[%c0_17, %c0_18] : memref<1x32xf32, #tpu.memory_space<vmem>>, vector<1x32xf32>
    %32 = vector.broadcast %31 : vector<1x32xf32> to vector<8x32xf32>
    %33 = arith.addf %30, %32 : vector<8x32xf32>
    %cst_19 = arith.constant 0.000000e+00 : f32
    %34 = vector.broadcast %cst_19 : f32 to vector<8x32xf32>
    %35 = arith.maximumf %33, %34 : vector<8x32xf32>
    %c0_20 = arith.constant 0 : index
    %c0_21 = arith.constant 0 : index
    %36 = vector.load %arg7[%c0_20, %c0_21] : memref<8x32xf32, #tpu.memory_space<vmem>>, vector<8x32xf32>
    tpu.vector_store %arg7[%c0_20, %c0_21], %35 {strides = array<i32>} : memref<8x32xf32, #tpu.memory_space<vmem>>, vector<8x32xf32>,
    return
  }
}

</mosaic_0001>

<bundles_post_ra>
// kernel: sage_forward_fused.1
= control target key start
LH: loop header
LB: loop body
LE: loop exit
PB: predicated region body
PF: predicated region fallthrough
CT: control target
= control target key end

     0   :  { %v703_v1 = vmov 0.0   ;;  %vm704_vm0 = vmmov 0   ;;  %vm73_vm1 = vcmask 392192   ;;  %s851_s0 = inlined_call_operand.vmem [shape: bf16[48,32], index: 0, kind: input, shape index: {}]   ;;  %s852_s1 = inlined_call_operand.vmem [shape: bf16[48,48], index: 1, kind: input, shape index: {}]   ;;  %s853_s2 = inlined_call_operand.vmem [shape: bf16[16,24], index: 2, kind: input, shape index: {}]   ;;  %s854_s3 = inlined_call_operand.vmem [shape: bf16[64,64], index: 3, kind: input, shape index: {}]   ;;  %s855_s4 = inlined_call_operand.vmem [shape: f32[1,64], index: 4, kind: input, shape index: {}]   ;;  %s856_s5 = inlined_call_operand.vmem [shape: bf16[128,32], index: 5, kind: input, shape index: {}]   ;;  %s857_s6 = inlined_call_operand.vmem [shape: f32[1,32], index: 6, kind: input, shape index: {}]   ;;  %s858_s7 = inlined_call_operand.hbm [shape: f32[8,32], index: 7, kind: output, shape index: {}]  }
   0x1   :  { %v660_v0 = vld [vmem:[%s851_s0] sm:$0xff]   ;;  %591 = vmatprep.subr.bf16.mxu0 %v703_v1  ;;  %v661_v2 = vld [vmem:[%s851_s0 + $0x8] sm:$0xff]   ;;  %597 = vmatprep.mubr.msk.bf16.mxu0 %vm704_vm0, %v703_v1  ;;  %v662_v3 = vld [vmem:[%s851_s0 + $0x10] sm:$0xff]  }
   0x2   :  { %592 = vmatpush3.bf16.msra.mxu0 %v660_v0  ;;  %v663_v4 = vld [vmem:[%s852_s1] sm:$0xff]  }
   0x3   :  { %593 = vmatprep.subr.bf16.mxu0 %v703_v1 }
   0x6   :  { %594 = vmatpush3.bf16.msra.mxu0 %v661_v2 }
   0x7   :  { %595 = vmatprep.subr.bf16.mxu0 %v703_v1 }
   0xa   :  { %596 = vmatpush3.bf16.msra.mxu0 %v662_v3 }
   0xb   :  { %633 = vmatprep.subr.bf16.mxu0 %v703_v1 }
   0xd   :  { %598 = vmatmul.mubr.msk.bf16.vlgmr.msra.gmra.mrb[0].mxu0 %vm73_vm1, %v663_v4 }
   0xe   :  { %601 = vmatprep.mubr.msk.bf16.mxu0 %vm704_vm0, %v703_v1 }
   0xf   :  { %12 = vsyncpa [#allocation3], 0  ;;  %v664_v5 = vld [vmem:[%s852_s1 + $0x8] sm:$0xff]   ;;  %v665_v6 = vld [vmem:[%s852_s1 + $0x10] sm:$0xff]   ;;  %vm164_vm2 = vcmask 261120   ;;  %vm311_vm3 = vcmask 1043456  }
  0x10   :  { %v666_v7 = vld [vmem:[%s854_s3 + $0x10] sm:$0xff]   ;;  %v667_v8 = vld [vmem:[%s854_s3 + $0x18] sm:$0xff]   ;;  %v668_v9 = vld [vmem:[%s854_s3] sm:$0xff]   ;;  %vm307_vm4 = vcmask 195584   ;;  %vm398_vm5 = vcmask 523264  }
  0x11   :  { %609 = vmatprep.subr.bf16.mxu1 %v666_v7  ;;  %v669_v25 = vld [vmem:[%s854_s3 + $0x8] sm:$0xff]   ;;  %v671_v27 = vld [vmem:[%s856_s5 + $0x20] sm:$0xff]   ;;  %v675_v29 = vld [vmem:[%s856_s5 + $0x30] sm:$0xff]  }
  0x12   :  { %610 = vmatpush3.bf16.msra.mxu1 %v666_v7  ;;  %634 = vmatpush3.bf16.msra.mxu0 %v671_v27  ;;  %v672_v28 = vld [vmem:[%s856_s5 + $0x28] sm:$0xff]   ;;  %v550_v35 = vld [vmem:[%s855_s4] ss:$0 sm:$0xff]  ;;  %v676_v54 = vld [vmem:[%s856_s5 + $0x10] sm:$0xff]  }
  0x13   :  { %611 = vmatprep.subr.bf16.mxu1 %v667_v8  ;;  %635 = vmatprep.subr.bf16.mxu0 %v703_v1  ;;  %v670_v51 = vld [vmem:[%s853_s2] sm:$0xff]   ;;  %v674_v53 = vld [vmem:[%s856_s5 + $0x8] sm:$0xff]   ;;  %v678_v55 = vld [vmem:[%s856_s5 + $0x18] sm:$0xff]  }
  0x14   :  { %v673_v52 = vld [vmem:[%s856_s5] sm:$0xff]   ;;  %v677_v56 = vld [vmem:[%s856_s5 + $0x38] sm:$0xff]   ;;  %s705_s5 = smov [#allocation2]  }
  0x15   :  { %602 = vmatmul.mubr.msk.bf16.gmra.mrb[4].mxu0 %vm73_vm1, %v664_v5  ;;  %v563_v2 = vld [vmem:[%s857_s6] ss:$0 sm:$0xff]  ;;  %s525_s14 = sshll.u32 %s705_s5, 4  ;;  %s526_s14 = int_to_ptr.vmem [resolvable:$true] %s525_s14 }
  0x16   :  { %605 = vmatprep.mubr.msk.bf16.mxu0 %vm704_vm0, %v703_v1  ;;  %612 = vmatpush3.bf16.msra.mxu1 %v667_v8  ;;  %s679_s15 = scalar_lea.vmem %s526_s14, 128  ;;  %p684_p1 = scmp.lt.s32.totalorder %s526_s14, %s526_s14 }
  0x17   :  { %617 = vmatprep.subr.bf16.mxu1 %v668_v9  ;;  %636 = vmatpush3.bf16.msra.mxu0 %v672_v28  ;;  %p680_p0 = scmp.ne.s32.totalorder %s526_s14, %s679_s15  ;;  %p685_p2 = scmp.lt.s32.totalorder %s679_s15, %s679_s15 }
  0x18   :  { %637 = vmatprep.subr.bf16.mxu0 %v703_v1 }
  0x19   :  { %p686_p3 = por %p685_p2, %p684_p1 }
  0x1b   :  { %638 = vmatpush3.bf16.msra.mxu0 %v675_v29  ;;  %p687_p4 = pnand %p686_p3, %p680_p0 }
  0x1c   :  { %639 = vmatprep.subr.bf16.mxu0 %v703_v1 }
  0x1d   :  { %606 = vmatmul.mubr.msk.bf16.gmra.mrb[8].mxu0 %vm73_vm1, %v665_v6 }
  0x1e   :  { %641 = vmatprep.mubr.msk.bf16.mxu0 %vm704_vm0, %v703_v1 }
  0x1f   :  { %640 = vmatpush3.bf16.msra.mxu0 %v677_v56 }
  0xe0   :  { %v117_v10 = vpop.f32.mrb[0].mxu0 }
  0xe1   :  { %v599_v11 = vpop.f32.mrb[1].mxu0 }
  0xe2   :  { %v120_v12 = vpop.f32.mrb[2].mxu0 }
  0xe3   :  { %v148_v13 = vpack.c.bf16 %v120_v12, %v117_v10  ;;  %v600_v14 = vpop.f32.mrb[3].mxu0 }
  0xe8   :  { %v125_v15 = vpop.f32.mrb[4].mxu0 }
  0xe9   :  { %v603_v16 = vpop.f32.mrb[5].mxu0  ;;  %v149_v26 = vpack.c.bf16 %v125_v15, %v125_v15 }
  0xea   :  { %v128_v17 = vpop.f32.mrb[6].mxu0 }
  0xeb   :  { %v604_v18 = vpop.f32.mrb[7].mxu0 }
  0xf0   :  { %v133_v19 = vpop.f32.mrb[8].mxu0 }
  0xf1   :  { %v150_v20 = vpack.c.bf16 %v133_v19, %v128_v17  ;;  %v607_v21 = vpop.f32.mrb[9].mxu0 }
  0xf2   :  { %v136_v22 = vpop.f32.mrb[10].mxu0 }
  0xf3   :  { %v151_v23 = vpack.c.bf16 %v136_v22, %v136_v22  ;;  %v608_v24 = vpop.f32.mrb[11].mxu0  ;;  %613 = vmatprep.mubr.msk.bf16.mxu1 %vm164_vm2, %v150_v20 }
  0xf5   :  { %614 = vmatmul.mubr.msk.bf16.vlgmr.msra.gmra.mrb[0].mxu1 %vm164_vm2, %v151_v23 }
  0xf6   :  { %618 = vmatpush3.bf16.msra.mxu1 %v668_v9  ;;  %621 = vmatprep.mubr.msk.bf16.mxu1 %vm164_vm2, %v148_v13 }
  0xf7   :  { %619 = vmatprep.subr.bf16.mxu1 %v669_v25 }
  0xfa   :  { %620 = vmatpush3.bf16.msra.mxu1 %v669_v25 }
  0xfb   :  { %625 = vmatprep.subr.bf16.mxu1 %v703_v1 }
  0xfd   :  { %622 = vmatmul.mubr.msk.bf16.vlgmr.msra.gmra.mrb[4].mxu1 %vm164_vm2, %v149_v26 }
  0xfe   :  { %629 = vmatprep.mubr.msk.bf16.mxu1 %vm704_vm0, %v703_v1 }
 0x1c8   :  { %v615_v30 = vpop.f32.mrb[0].mxu1 }
 0x1c9   :  { %v205_v31 = vpop.f32.mrb[1].mxu1 }
 0x1ca   :  { %v616_v32 = vpop.f32.mrb[2].mxu1 }
 0x1cb   :  { %v208_v33 = vpop.f32.mrb[3].mxu1 }
 0x1d0   :  { %v623_v34 = vpop.f32.mrb[4].mxu1 }
 0x1d1   :  { %v280_v36 = vadd.f32 %v623_v34, %v615_v30  ;;  %v271_v37 = vpop.f32.mrb[5].mxu1 }
 0x1d2   :  { %v272_v38 = vadd.f32 %v271_v37, %v205_v31  ;;  %v624_v39 = vpop.f32.mrb[6].mxu1 }
 0x1d3   :  { %v294_v40 = vadd.f32 %v550_v35, %v280_v36  ;;  %v274_v41 = vpop.f32.mrb[7].mxu1 }
 0x1d4   :  { %v292_v42 = vadd.f32 %v550_v35, %v272_v38  ;;  %v275_v43 = vadd.f32 %v274_v41, %v208_v33 }
 0x1d5   :  { %v297_v45 = vmax.f32 %v294_v40, 0.0 }
 0x1d6   :  { %v293_v44 = vadd.f32 %v550_v35, %v275_v43  ;;  %v295_v46 = vmax.f32 %v292_v42, 0.0 }
 0x1d7   :  { %v301_v49 = vpack.c.bf16 %v297_v45, %v297_v45 }
 0x1d8   :  { %v296_v47 = vmax.f32 %v293_v44, 0.0 }
 0x1d9   :  { %v313_v50 = vsel %vm311_vm3, %v301_v49, 0 }
 0x1da   :  { %v300_v48 = vpack.c.bf16 %v296_v47, %v295_v46 }
 0x1dc   :  { %626 = vmatpush3.bf16.msra.mxu1 %v300_v48 }
 0x1dd   :  { %627 = vmatprep.subr.bf16.mxu1 %v703_v1 }
 0x1e0   :  { %628 = vmatpush3.bf16.msra.mxu1 %v313_v50 }
 0x1e1   :  { %645 = vmatprep.subr.bf16.mxu1 %v703_v1 }
 0x1e3   :  { %630 = vmatmul.mubr.msk.bf16.vlgmr.msra.gmra.mrb[8].mxu1 %vm307_vm4, %v670_v51 }
 0x1e4   :  { %646 = vmatpush3.bf16.msra.mxu1 %v673_v52  ;;  %653 = vmatprep.mubr.msk.bf16.mxu1 %vm704_vm0, %v703_v1 }
 0x1e5   :  { %647 = vmatprep.subr.bf16.mxu1 %v703_v1 }
 0x1e8   :  { %648 = vmatpush3.bf16.msra.mxu1 %v674_v53 }
 0x1e9   :  { %649 = vmatprep.subr.bf16.mxu1 %v703_v1 }
 0x1ec   :  { %650 = vmatpush3.bf16.msra.mxu1 %v676_v54 }
 0x1ed   :  { %651 = vmatprep.subr.bf16.mxu1 %v703_v1 }
 0x1f0   :  { %652 = vmatpush3.bf16.msra.mxu1 %v678_v55 }
 0x2b6   :  { %v349_v57 = vpop.f32.mrb[8].mxu1 }
 0x2b7   :  { %v372_v58 = vpack.c.bf16 %v349_v57, %v349_v57  ;;  %v631_v59 = vpop.f32.mrb[9].mxu1 }
 0x2b8   :  { %v352_v60 = vpop.f32.mrb[10].mxu1 }
 0x2b9   :  { %v373_v61 = vpack.c.bf16 %v352_v60, %v352_v60  ;;  %v632_v62 = vpop.f32.mrb[11].mxu1  ;;  %654 = vmatmul.mubr.msk.bf16.vlgmr.msra.gmra.mrb[12].mxu1 %vm398_vm5, %v372_v58 }
 0x2bb   :  { %642 = vmatmul.mubr.msk.bf16.vlgmr.msra.gmra.mrb[12].mxu0 %vm398_vm5, %v373_v61 }
 0x38c   :  { %v503_v63 = vpop.f32.mrb[12].mxu1 }
 0x38d   :  { %v655_v0 = vpop.f32.mrb[13].mxu1 }
 0x38e   :  { %v436_v1 = vpop.f32.mrb[12].mxu0  ;;  %v506_v3 = vpop.f32.mrb[14].mxu1 }
 0x38f   :  { %v504_v4 = vadd.f32 %v503_v63, %v436_v1  ;;  %v643_v5 = vpop.f32.mrb[13].mxu0  ;;  %v656_v6 = vpop.f32.mrb[15].mxu1 }
 0x390   :  { %v439_v7 = vpop.f32.mrb[14].mxu0 }
 0x391   :  { %v516_v8 = vadd.f32 %v563_v2, %v504_v4  ;;  %v644_v9 = vpop.f32.mrb[15].mxu0 }
 0x393   :  { %v517_v10 = vmax.f32 %v516_v8, 0.0 }
 0x395   :  { %518 = vst.msk [vmem:[#allocation2] sm:$0xff] %vm164_vm2, %v517_v10 }
 0x396   :  { %690 = shalt.err (!%p687_p4)
}
 0x397   :  { %s691_s17 = scalar_lea.hbm %s858_s7, 128 }
 0x398   :  { %p692_p5 = scmp.ne.s32.totalorder %s858_s7, %s691_s17  ;;  %p695_p6 = scmp.lt.u32.totalorder %s691_s17, %s858_s7 }
 0x39a   :  { %p697_p7 = pnand %p695_p6, %p692_p5 }
 0x39c   :  { %700 = shalt.err (!%p697_p7)
}
 0x39d   :  { %528 = dma.vmem_to_hbm [thread:$0]  %s526_s14, 128, %s858_s7, [#allocation3]  }
 0x39e   :  { %701 = dma.done.wait [#allocation3], 128  }
 0x39f   :  { %702 = vsyncadd [#allocation3], 4294967168 }
 0x3a0   :  { %532 = vsyncpa [#allocation3], 1 }

</bundles_post_ra>
